<compile_context>
chip_gen: v7x
topology: tpu7x:2x2x1
jax: 0.10.0
libtpu: 0.0.40
codegen_flags: <defaults>
</compile_context>

<pallas_src>
import jax
import jax.numpy as jnp
from jax import lax
from jax.experimental import pallas as pl
from jax.experimental.pallas import tpu as pltpu

NEG = -1.0e30  # "not a detection" sentinel (strictly below any sane threshold)


def _make_topk_nms_kernel(cc, n, t_iter, t_pad, score_threshold, nms_threshold,
                          use_nms):
    """Kernel over one (batch, class-chunk) cell: (CC, N) scores + (4, N) boxes
    -> per-class top-T (score, anchor index), greedy-NMS filtered."""
    CC, N, T, TP = cc, n, t_iter, t_pad

    def kernel(boxes_ref, cls_ref, out_s_ref, out_i_ref):
        b4n = boxes_ref[0]                                     # (4, N) f32
        # Hoisted, materialized at (CC, N): no broadcast_in_dim in the loop.
        x1b = jnp.broadcast_to(b4n[0:1, :], (CC, N))
        y1b = jnp.broadcast_to(b4n[1:2, :], (CC, N))
        x2b = jnp.broadcast_to(b4n[2:3, :], (CC, N))
        y2b = jnp.broadcast_to(b4n[3:4, :], (CC, N))
        area_b = (x2b - x1b) * (y2b - y1b)                     # (CC, N)
        lane = lax.broadcasted_iota(jnp.int32, (CC, N), 1)     # anchor index
        slot = lax.broadcasted_iota(jnp.int32, (1, TP), 1)     # output lane

        scores = cls_ref[0]                                    # (CC, N)
        cand0 = jnp.where(scores > score_threshold, scores, NEG)

        out_s0 = jnp.full((CC, TP), NEG, jnp.float32)
        out_i0 = jnp.zeros((CC, TP), jnp.int32)

        def cond(carry):
            t, _, _, _, alive = carry
            return jnp.logical_and(t < T, alive > 0)

        def body(carry):
            t, cand, out_s, out_i, _ = carry
            # Pick the best remaining candidate of each class row.
            best = jnp.max(cand, axis=-1, keepdims=True)       # (CC, 1)
            has = best > NEG * 0.5                              # (CC, 1) bool
            idx = jnp.min(jnp.where(cand >= best, lane, N),     # deterministic
                          axis=-1, keepdims=True)               # tie-break: min anchor
            picked = lane == idx                                 # (CC, N) one-hot

            # Emit (score, anchor) into output lane t (descending score order).
            sel = slot == t                                      # (1, TP)
            out_s = jnp.where(sel, jnp.where(has, best, NEG), out_s)
            out_i = jnp.where(sel, jnp.where(has, idx, 0), out_i)

            if use_nms:
                # Picked-box coords: 4 masked lane-reductions, 8 classes/op.
                px1 = jnp.sum(jnp.where(picked, x1b, 0.0), axis=-1, keepdims=True)
                py1 = jnp.sum(jnp.where(picked, y1b, 0.0), axis=-1, keepdims=True)
                px2 = jnp.sum(jnp.where(picked, x2b, 0.0), axis=-1, keepdims=True)
                py2 = jnp.sum(jnp.where(picked, y2b, 0.0), axis=-1, keepdims=True)
                iw = jnp.maximum(jnp.minimum(px2, x2b) - jnp.maximum(px1, x1b), 0.0)
                ih = jnp.maximum(jnp.minimum(py2, y2b) - jnp.maximum(py1, y1b), 0.0)
                inter = iw * ih
                p_area = (px2 - px1) * (py2 - py1)               # (CC, 1)
                union = p_area + area_b - inter                  # (CC, N)
                # Exact, division-free IoU > threshold test.
                suppress = jnp.logical_or(inter > nms_threshold * union, picked)
            else:
                suppress = picked

            # Gate on `has` so exhausted rows never suppress from a stale box.
            cand = jnp.where(jnp.logical_and(suppress, has), NEG, cand)
            alive = (jnp.max(best) > NEG * 0.5).astype(jnp.int32)
            return t + jnp.int32(1), cand, out_s, out_i, alive

        carry0 = (jnp.int32(0), cand0, out_s0, out_i0, jnp.int32(1))
        _, _, out_s, out_i, _ = lax.while_loop(cond, body, carry0)
        out_s_ref[0] = out_s
        out_i_ref[0] = out_i

    return kernel


def _per_class_topk_pallas(boxes_4n, cls_cn, score_threshold, nms_threshold,
                           use_nms, max_detections):
    """boxes_4n: (B, 4, N); cls_cn: (B, C, N).
    Returns (scores, anchor_idx) each (B, C_pad, T_pad): per-class top-T
    greedy-NMS survivors in descending score order (NEG / 0 padded)."""
    B, four, N = boxes_4n.shape
    assert four == 4
    C = cls_cn.shape[1]

    CC = C if C <= 8 else 8
    n_chunks = -(-C // CC)
    C_pad = n_chunks * CC
    if C_pad != C:
        pad = jnp.full((B, C_pad - C, N), NEG, jnp.float32)
        cls_cn = jnp.concatenate([cls_cn.astype(jnp.float32), pad], axis=1)

    # Every successful greedy-NMS iteration keeps exactly one box, picks are in
    # descending score order, and only the per-class top max_detections can
    # reach the global top-k -> T = min(N, max_detections) preserves results.
    T = min(N, int(max_detections))
    TP = max(128, ((T + 127) // 128) * 128)

    kernel = _make_topk_nms_kernel(CC, N, T, TP, float(score_threshold),
                                   float(nms_threshold), bool(use_nms))

    scores, idx = pl.pallas_call(
        kernel,
        out_shape=(jax.ShapeDtypeStruct((B, C_pad, TP), jnp.float32),
                   jax.ShapeDtypeStruct((B, C_pad, TP), jnp.int32)),
        grid_spec=pltpu.PrefetchScalarGridSpec(
            num_scalar_prefetch=0,
            grid=(B, n_chunks),
            in_specs=[
                # Boxes stay resident across the class-chunk axis.
                pl.BlockSpec((1, 4, N), lambda b, c: (b, 0, 0)),
                pl.BlockSpec((1, CC, N), lambda b, c: (b, c, 0)),
            ],
            out_specs=[
                pl.BlockSpec((1, CC, TP), lambda b, c: (b, c, 0)),
                pl.BlockSpec((1, CC, TP), lambda b, c: (b, c, 0)),
            ],
        ),
        compiler_params=pltpu.CompilerParams(
            dimension_semantics=("parallel", "parallel")),
    )(boxes_4n.astype(jnp.float32), cls_cn.astype(jnp.float32))
    return scores, idx


def _pad_rows(x, target, value):
    pad = target - x.shape[1]
    if pad <= 0:
        return x
    pad_shape = (x.shape[0], pad) + x.shape[2:]
    return jnp.concatenate([x, jnp.full(pad_shape, value, x.dtype)], axis=1)


class FilterDetections:
    """JAX/Pallas equivalent of the PyTorch FilterDetections module."""

    def __init__(self, num_rotation_parameters, num_translation_parameters=3, nms=True,
                 class_specific_filter=True, nms_threshold=0.5, score_threshold=0.01,
                 max_detections=100, name=None):
        self.num_rotation_parameters = num_rotation_parameters
        self.num_translation_parameters = num_translation_parameters
        self.nms = nms
        self.class_specific_filter = class_specific_filter
        self.nms_threshold = nms_threshold
        self.score_threshold = score_threshold
        self.max_detections = max_detections
        self.name = name

    def __call__(self, inputs):
        boxes, classification, rotation, translation = inputs
        B, N, _ = boxes.shape

        # TODO(synk): these XLA transposes are an extra HBM round trip; produce
        # anchor-minor layouts upstream (or fuse via allow_input_fusion) if the
        # end-to-end pipeline makes them measurable at large N.
        boxes_t = jnp.transpose(boxes, (0, 2, 1))                            # (B, 4, N)

        best_labels = None
        if self.class_specific_filter:
            cls_cn = jnp.transpose(classification, (0, 2, 1))                # (B, C, N)
        else:
            best_scores = jnp.max(classification, axis=-1)                   # (B, N)
            best_labels = jnp.argmax(classification, axis=-1)                # (B, N)
            cls_cn = best_scores[:, None, :]                                 # (B, 1, N)

        topk_scores, topk_anchor = _per_class_topk_pallas(
            boxes_t, cls_cn, self.score_threshold, self.nms_threshold,
            self.nms, self.max_detections)                                   # (B, Cp, TP)

        Cp, TP = topk_scores.shape[1], topk_scores.shape[2]
        flat_s = topk_scores.reshape(B, Cp * TP)
        flat_a = topk_anchor.reshape(B, Cp * TP)

        k = min(self.max_detections, Cp * TP)
        scores_k, sel = lax.top_k(flat_s, k)                                 # (B, k)
        anchors = jnp.take_along_axis(flat_a, sel, axis=1)                   # (B, k)
        if self.class_specific_filter:
            labels_k = (sel // TP).astype(jnp.int32)
        else:
            labels_k = jnp.take_along_axis(best_labels, anchors, axis=1).astype(jnp.int32)
        valid = scores_k > self.score_threshold

        gather = lambda x: jnp.take_along_axis(x, anchors[..., None], axis=1)
        boxes_out = jnp.where(valid[..., None], gather(boxes), -1.0)
        scores_out = jnp.where(valid, scores_k, -1.0)
        # TODO(synk): PyTorch uses int64 labels; JAX default (no x64) is int32.
        labels_out = jnp.where(valid, labels_k, -1).astype(jnp.int32)
        rot_out = jnp.where(valid[..., None], gather(rotation), -1.0)
        trans_out = jnp.where(valid[..., None], gather(translation), -1.0)

        if k < self.max_detections:
            boxes_out = _pad_rows(boxes_out, self.max_detections, -1.0)
            scores_out = _pad_rows(scores_out, self.max_detections, -1.0)
            labels_out = _pad_rows(labels_out, self.max_detections, -1)
            rot_out = _pad_rows(rot_out, self.max_detections, -1.0)
            trans_out = _pad_rows(trans_out, self.max_detections, -1.0)

        return [boxes_out, scores_out, labels_out, rot_out, trans_out]


if __name__ == "__main__":
    key = jax.random.PRNGKey(0)
    B, N, C, R, Tt = 2, 128, 10, 3, 3        # C=10 exercises class-chunk padding (C_pad=16)
    MAX_DET = 100

    k1, k2, k3, k4, k5 = jax.random.split(key, 5)
    centers = jax.random.uniform(k1, (B, N, 2), minval=0.0, maxval=512.0)
    sizes = jax.random.uniform(k2, (B, N, 2), minval=8.0, maxval=96.0)
    boxes = jnp.concatenate([centers - sizes / 2.0, centers + sizes / 2.0], axis=-1)
    classification = jax.nn.sigmoid(2.0 * jax.random.normal(k3, (B, N, C)))
    rotation = jax.random.normal(k4, (B, N, R))
    translation = jax.random.normal(k5, (B, N, Tt))
    inputs = [boxes, classification, rotation, translation]

    # Class-specific filtering + NMS (two class chunks of 8 sublanes each).
    mod_a = FilterDetections(num_rotation_parameters=R, num_translation_parameters=Tt,
                             nms=True, class_specific_filter=True,
                             nms_threshold=0.5, score_threshold=0.01,
                             max_detections=MAX_DET)
    outs_a = jax.block_until_ready(mod_a(inputs))
    assert outs_a[0].shape == (B, MAX_DET, 4)
    assert outs_a[1].shape == (B, MAX_DET)
    assert outs_a[2].shape == (B, MAX_DET)
    assert outs_a[3].shape == (B, MAX_DET, R)
    assert outs_a[4].shape == (B, MAX_DET, Tt)

    # Class-agnostic filtering (single class row) + NMS.
    mod_b = FilterDetections(num_rotation_parameters=R, num_translation_parameters=Tt,
                             nms=True, class_specific_filter=False,
                             nms_threshold=0.5, score_threshold=0.01,
                             max_detections=MAX_DET)
    outs_b = jax.block_until_ready(mod_b(inputs))
    assert outs_b[0].shape == (B, MAX_DET, 4)
    assert outs_b[1].shape == (B, MAX_DET)
    assert outs_b[2].shape == (B, MAX_DET)
    assert outs_b[3].shape == (B, MAX_DET, R)
    assert outs_b[4].shape == (B, MAX_DET, Tt)

    print("KERNEL_OK")
</pallas_src>

<mosaic_0001>
module attributes {stable_mosaic.version = 11 : i64} {
  func.func @kernel(%arg0: i32, %arg1: i32, %arg2: memref<1x4x128xf32, #tpu.memory_space<vmem>>, %arg3: memref<1x8x128xf32, #tpu.memory_space<vmem>>, %arg4: memref<1x8x128xf32, #tpu.memory_space<vmem>>, %arg5: memref<1x8x128xi32, #tpu.memory_space<vmem>>) attributes {dimension_semantics = [#tpu.dimension_semantics<parallel>, #tpu.dimension_semantics<parallel>], iteration_bounds = array<i64: 2, 2>, scalar_prefetch = 0 : i64, scratch_operands = 0 : i64, tpu.core_type = #tpu.core_type<tc>, window_params = [{transform_indices = @transform_0, window_bounds = array<i64: 1, 4, 128>}, {transform_indices = @transform_1, window_bounds = array<i64: 1, 8, 128>}, {transform_indices = @transform_2, window_bounds = array<i64: 1, 8, 128>}, {transform_indices = @transform_3, window_bounds = array<i64: 1, 8, 128>}]} {
    %c0 = arith.constant 0 : index
    %c0_0 = arith.constant 0 : index
    %c0_1 = arith.constant 0 : index
    %0 = vector.load %arg2[%c0, %c0_0, %c0_1] : memref<1x4x128xf32, #tpu.memory_space<vmem>>, vector<1x4x128xf32>
    %1 = vector.shape_cast %0 : vector<1x4x128xf32> to vector<4x128xf32>
    %2 = vector.extract_strided_slice %1 {offsets = [0, 0], sizes = [1, 128], strides = [1, 1]} : vector<4x128xf32> to vector<1x128xf32>
    %3 = vector.shape_cast %2 : vector<1x128xf32> to vector<1x128xf32>
    %4 = vector.broadcast %3 : vector<1x128xf32> to vector<8x128xf32>
    %5 = vector.extract_strided_slice %1 {offsets = [1, 0], sizes = [1, 128], strides = [1, 1]} : vector<4x128xf32> to vector<1x128xf32>
    %6 = vector.shape_cast %5 : vector<1x128xf32> to vector<1x128xf32>
    %7 = vector.broadcast %6 : vector<1x128xf32> to vector<8x128xf32>
    %8 = vector.extract_strided_slice %1 {offsets = [2, 0], sizes = [1, 128], strides = [1, 1]} : vector<4x128xf32> to vector<1x128xf32>
    %9 = vector.shape_cast %8 : vector<1x128xf32> to vector<1x128xf32>
    %10 = vector.broadcast %9 : vector<1x128xf32> to vector<8x128xf32>
    %11 = vector.extract_strided_slice %1 {offsets = [3, 0], sizes = [1, 128], strides = [1, 1]} : vector<4x128xf32> to vector<1x128xf32>
    %12 = vector.shape_cast %11 : vector<1x128xf32> to vector<1x128xf32>
    %13 = vector.broadcast %12 : vector<1x128xf32> to vector<8x128xf32>
    %14 = arith.subf %10, %4 : vector<8x128xf32>
    %15 = arith.subf %13, %7 : vector<8x128xf32>
    %16 = arith.mulf %14, %15 : vector<8x128xf32>
    %17 = tpu.iota {dimensions = array<i32: 1>} : vector<8x128xi32>
    %18 = tpu.iota {dimensions = array<i32: 1>} : vector<1x128xi32>
    %c0_2 = arith.constant 0 : index
    %c0_3 = arith.constant 0 : index
    %c0_4 = arith.constant 0 : index
    %19 = vector.load %arg3[%c0_2, %c0_3, %c0_4] : memref<1x8x128xf32, #tpu.memory_space<vmem>>, vector<1x8x128xf32>
    %20 = vector.shape_cast %19 : vector<1x8x128xf32> to vector<8x128xf32>
    %cst = arith.constant 0.00999999977 : f32
    %21 = vector.broadcast %cst : f32 to vector<8x128xf32>
    %22 = arith.cmpf ogt, %20, %21 : vector<8x128xf32>
    %cst_5 = arith.constant -1.000000e+30 : f32
    %23 = vector.broadcast %cst_5 : f32 to vector<8x128xf32>
    %24 = arith.select %22, %20, %23 : vector<8x128xi1>, vector<8x128xf32>
    %cst_6 = arith.constant -1.000000e+30 : f32
    %25 = vector.broadcast %cst_6 : f32 to vector<8x128xf32>
    %c0_i32 = arith.constant 0 : i32
    %26 = vector.broadcast %c0_i32 : i32 to vector<8x128xi32>
    %c0_i32_7 = arith.constant 0 : i32
    %c1_i32 = arith.constant 1 : i32
    %27:5 = scf.while (%arg6 = %c0_i32_7, %arg7 = %24, %arg8 = %25, %arg9 = %26, %arg10 = %c1_i32) : (i32, vector<8x128xf32>, vector<8x128xf32>, vector<8x128xi32>, i32) -> (i32, vector<8x128xf32>, vector<8x128xf32>, vector<8x128xi32>, i32) {
      %c100_i32 = arith.constant 100 : i32
      %34 = arith.cmpi slt, %arg6, %c100_i32 : i32
      %c0_i32_14 = arith.constant 0 : i32
      %35 = arith.cmpi sgt, %arg10, %c0_i32_14 : i32
      %36 = arith.andi %34, %35 : i1
      scf.condition(%36) %arg6, %arg7, %arg8, %arg9, %arg10 : i32, vector<8x128xf32>, vector<8x128xf32>, vector<8x128xi32>, i32
    } do {
    ^bb0(%arg6: i32, %arg7: vector<8x128xf32>, %arg8: vector<8x128xf32>, %arg9: vector<8x128xi32>, %arg10: i32):
      %cst_14 = arith.constant dense<0xFF800000> : vector<8xf32>
      %34 = vector.multi_reduction <maximumf>, %arg7, %cst_14 [1] : vector<8x128xf32> to vector<8xf32>
      %35 = vector.shape_cast %34 : vector<8xf32> to vector<8x1xf32>
      %cst_15 = arith.constant -5.000000e+29 : f32
      %36 = vector.broadcast %cst_15 : f32 to vector<8x1xf32>
      %37 = arith.cmpf ogt, %35, %36 : vector<8x1xf32>
      %38 = vector.broadcast %35 : vector<8x1xf32> to vector<8x128xf32>
      %39 = arith.cmpf oge, %arg7, %38 : vector<8x128xf32>
      %c128_i32 = arith.constant 128 : i32
      %40 = vector.broadcast %c128_i32 : i32 to vector<8x128xi32>
      %41 = arith.select %39, %17, %40 : vector<8x128xi1>, vector<8x128xi32>
      %cst_16 = arith.constant dense<2147483647> : vector<8xi32>
      %42 = vector.multi_reduction <minsi>, %41, %cst_16 [1] : vector<8x128xi32> to vector<8xi32>
      %43 = vector.shape_cast %42 : vector<8xi32> to vector<8x1xi32>
      %44 = vector.broadcast %43 : vector<8x1xi32> to vector<8x128xi32>
      %45 = arith.cmpi eq, %17, %44 : vector<8x128xi32>
      %46 = vector.broadcast %arg6 : i32 to vector<1x128xi32>
      %47 = arith.cmpi eq, %18, %46 : vector<1x128xi32>
      %cst_17 = arith.constant -1.000000e+30 : f32
      %48 = vector.broadcast %cst_17 : f32 to vector<8x1xf32>
      %49 = arith.select %37, %35, %48 : vector<8x1xi1>, vector<8x1xf32>
      %50 = vector.shape_cast %47 : vector<1x128xi1> to vector<1x128xi1>
      %51 = vector.broadcast %50 : vector<1x128xi1> to vector<8x128xi1>
      %52 = vector.shape_cast %49 : vector<8x1xf32> to vector<8x1xf32>
      %53 = vector.broadcast %52 : vector<8x1xf32> to vector<8x128xf32>
      %54 = arith.select %51, %53, %arg8 : vector<8x128xi1>, vector<8x128xf32>
      %c0_i32_18 = arith.constant 0 : i32
      %55 = vector.broadcast %c0_i32_18 : i32 to vector<8x1xi32>
      %56 = arith.select %37, %43, %55 : vector<8x1xi1>, vector<8x1xi32>
      %57 = vector.shape_cast %47 : vector<1x128xi1> to vector<1x128xi1>
      %58 = vector.broadcast %57 : vector<1x128xi1> to vector<8x128xi1>
      %59 = vector.shape_cast %56 : vector<8x1xi32> to vector<8x1xi32>
      %60 = vector.broadcast %59 : vector<8x1xi32> to vector<8x128xi32>
      %61 = arith.select %58, %60, %arg9 : vector<8x128xi1>, vector<8x128xi32>
      %cst_19 = arith.constant 0.000000e+00 : f32
      %62 = vector.broadcast %cst_19 : f32 to vector<8x128xf32>
      %63 = arith.select %45, %4, %62 : vector<8x128xi1>, vector<8x128xf32>
      %cst_20 = arith.constant dense<0.000000e+00> : vector<8xf32>
      %64 = vector.multi_reduction <add>, %63, %cst_20 [1] : vector<8x128xf32> to vector<8xf32>
      %65 = vector.shape_cast %64 : vector<8xf32> to vector<8x1xf32>
      %cst_21 = arith.constant 0.000000e+00 : f32
      %66 = vector.broadcast %cst_21 : f32 to vector<8x128xf32>
      %67 = arith.select %45, %7, %66 : vector<8x128xi1>, vector<8x128xf32>
      %cst_22 = arith.constant dense<0.000000e+00> : vector<8xf32>
      %68 = vector.multi_reduction <add>, %67, %cst_22 [1] : vector<8x128xf32> to vector<8xf32>
      %69 = vector.shape_cast %68 : vector<8xf32> to vector<8x1xf32>
      %cst_23 = arith.constant 0.000000e+00 : f32
      %70 = vector.broadcast %cst_23 : f32 to vector<8x128xf32>
      %71 = arith.select %45, %10, %70 : vector<8x128xi1>, vector<8x128xf32>
      %cst_24 = arith.constant dense<0.000000e+00> : vector<8xf32>
      %72 = vector.multi_reduction <add>, %71, %cst_24 [1] : vector<8x128xf32> to vector<8xf32>
      %73 = vector.shape_cast %72 : vector<8xf32> to vector<8x1xf32>
      %cst_25 = arith.constant 0.000000e+00 : f32
      %74 = vector.broadcast %cst_25 : f32 to vector<8x128xf32>
      %75 = arith.select %45, %13, %74 : vector<8x128xi1>, vector<8x128xf32>
      %cst_26 = arith.constant dense<0.000000e+00> : vector<8xf32>
      %76 = vector.multi_reduction <add>, %75, %cst_26 [1] : vector<8x128xf32> to vector<8xf32>
      %77 = vector.shape_cast %76 : vector<8xf32> to vector<8x1xf32>
      %78 = vector.broadcast %73 : vector<8x1xf32> to vector<8x128xf32>
      %79 = arith.minimumf %78, %10 : vector<8x128xf32>
      %80 = vector.broadcast %65 : vector<8x1xf32> to vector<8x128xf32>
      %81 = arith.maximumf %80, %4 : vector<8x128xf32>
      %82 = arith.subf %79, %81 : vector<8x128xf32>
      %cst_27 = arith.constant 0.000000e+00 : f32
      %83 = vector.broadcast %cst_27 : f32 to vector<8x128xf32>
      %84 = arith.maximumf %82, %83 : vector<8x128xf32>
      %85 = vector.broadcast %77 : vector<8x1xf32> to vector<8x128xf32>
      %86 = arith.minimumf %85, %13 : vector<8x128xf32>
      %87 = vector.broadcast %69 : vector<8x1xf32> to vector<8x128xf32>
      %88 = arith.maximumf %87, %7 : vector<8x128xf32>
      %89 = arith.subf %86, %88 : vector<8x128xf32>
      %cst_28 = arith.constant 0.000000e+00 : f32
      %90 = vector.broadcast %cst_28 : f32 to vector<8x128xf32>
      %91 = arith.maximumf %89, %90 : vector<8x128xf32>
      %92 = arith.mulf %84, %91 : vector<8x128xf32>
      %93 = arith.subf %73, %65 : vector<8x1xf32>
      %94 = arith.subf %77, %69 : vector<8x1xf32>
      %95 = arith.mulf %93, %94 : vector<8x1xf32>
      %96 = vector.broadcast %95 : vector<8x1xf32> to vector<8x128xf32>
      %97 = arith.addf %96, %16 : vector<8x128xf32>
      %98 = arith.subf %97, %92 : vector<8x128xf32>
      %cst_29 = arith.constant 5.000000e-01 : f32
      %99 = vector.broadcast %cst_29 : f32 to vector<8x128xf32>
      %100 = arith.mulf %99, %98 : vector<8x128xf32>
      %101 = arith.cmpf ogt, %92, %100 : vector<8x128xf32>
      %102 = arith.ori %101, %45 : vector<8x128xi1>
      %103 = vector.broadcast %37 : vector<8x1xi1> to vector<8x128xi1>
      %104 = arith.andi %102, %103 : vector<8x128xi1>
      %cst_30 = arith.constant -1.000000e+30 : f32
      %105 = vector.broadcast %cst_30 : f32 to vector<8x128xf32>
      %106 = arith.select %104, %105, %arg7 : vector<8x128xi1>, vector<8x128xf32>
      %107 = vector.shape_cast %35 : vector<8x1xf32> to vector<1x8x1xf32>
      %cst_31 = arith.constant dense<0xFF800000> : vector<1xf32>
      %108 = vector.multi_reduction <maximumf>, %107, %cst_31 [1, 2] : vector<1x8x1xf32> to vector<1xf32>
      %109 = vector.shape_cast %108 : vector<1xf32> to vector<1x1x1xf32>
      %110 = vector.extract %109[0, 0, 0] : f32 from vector<1x1x1xf32>
      %cst_32 = arith.constant -5.000000e+29 : f32
      %111 = arith.cmpf ogt, %110, %cst_32 : f32
      %112 = arith.extui %111 : i1 to i32
      %c1_i32_33 = arith.constant 1 : i32
      %113 = arith.addi %arg6, %c1_i32_33 : i32
      scf.yield %113, %106, %54, %61, %112 : i32, vector<8x128xf32>, vector<8x128xf32>, vector<8x128xi32>, i32
    }
    %c0_8 = arith.constant 0 : index
    %c0_9 = arith.constant 0 : index
    %c0_10 = arith.constant 0 : index
    %28 = vector.load %arg4[%c0_8, %c0_9, %c0_10] : memref<1x8x128xf32, #tpu.memory_space<vmem>>, vector<1x8x128xf32>
    %29 = vector.shape_cast %28 : vector<1x8x128xf32> to vector<8x128xf32>
    %30 = vector.shape_cast %27#2 : vector<8x128xf32> to vector<1x8x128xf32>
    tpu.vector_store %arg4[%c0_8, %c0_9, %c0_10], %30 {strides = array<i32>} : memref<1x8x128xf32, #tpu.memory_space<vmem>>, vector<1x8x128xf32>,
    %c0_11 = arith.constant 0 : index
    %c0_12 = arith.constant 0 : index
    %c0_13 = arith.constant 0 : index
    %31 = vector.load %arg5[%c0_11, %c0_12, %c0_13] : memref<1x8x128xi32, #tpu.memory_space<vmem>>, vector<1x8x128xi32>
    %32 = vector.shape_cast %31 : vector<1x8x128xi32> to vector<8x128xi32>
    %33 = vector.shape_cast %27#3 : vector<8x128xi32> to vector<1x8x128xi32>
    tpu.vector_store %arg5[%c0_11, %c0_12, %c0_13], %33 {strides = array<i32>} : memref<1x8x128xi32, #tpu.memory_space<vmem>>, vector<1x8x128xi32>,
    return
  }
  func.func @transform_0(%arg0: i32, %arg1: i32) -> (i32, i32, i32) {
    %c0_i32 = arith.constant 0 : i32
    %c0_i32_0 = arith.constant 0 : i32
    %c0_i32_1 = arith.constant 0 : i32
    return %arg0, %c0_i32, %c0_i32_0 : i32, i32, i32
  }
  func.func @transform_1(%arg0: i32, %arg1: i32) -> (i32, i32, i32) {
    %c0_i32 = arith.constant 0 : i32
    %c0_i32_0 = arith.constant 0 : i32
    return %arg0, %arg1, %c0_i32 : i32, i32, i32
  }
  func.func @transform_2(%arg0: i32, %arg1: i32) -> (i32, i32, i32) {
    %c0_i32 = arith.constant 0 : i32
    %c0_i32_0 = arith.constant 0 : i32
    return %arg0, %arg1, %c0_i32 : i32, i32, i32
  }
  func.func @transform_3(%arg0: i32, %arg1: i32) -> (i32, i32, i32) {
    %c0_i32 = arith.constant 0 : i32
    %c0_i32_0 = arith.constant 0 : i32
    return %arg0, %arg1, %c0_i32 : i32, i32, i32
  }
}

</mosaic_0001>

<bundles_post_ra>
// kernel: tpu_custom_call.1
= control target key start
LH: loop header
LB: loop body
LE: loop exit
PB: predicated region body
PF: predicated region fallthrough
CT: control target
= control target key end

     0   :  { %s1436_s0 = inlined_call_operand.hbm [shape: f32[2,4,128], index: 0, kind: input, shape index: {}]   ;;  %s1437_s1 = inlined_call_operand.hbm [shape: f32[2,16,128], index: 1, kind: input, shape index: {}]   ;;  %s1438_s2 = inlined_call_operand.hbm [shape: f32[2,16,128], index: 2, kind: output, shape index: {0}]   ;;  %s1439_s3 = inlined_call_operand.hbm [shape: s32[2,16,128], index: 3, kind: output, shape index: {1}]  }
   0x1   :  { %1453 = sst [smem:[#allocation19_spill]] %s1436_s0 }
   0x2   :  { %1454 = sst [smem:[#allocation20_spill]] %s1438_s2 }
   0x3   :  { %1455 = sst [smem:[#allocation21_spill]] %s1439_s3 }
   0x4   :  { %9 = vsyncpa [#allocation3], 0 }
   0x5   :  { %11 = vsyncpa [#allocation3 + $0x1], 0 }
   0x6   :  { %12 = vsyncpa [#allocation6], 0 }
   0x7   :  { %14 = vsyncpa [#allocation6 + $0x1], 0 }
   0x8   :  { %15 = vsyncpa [#allocation4], 0 }
   0x9   :  { %17 = vsyncpa [#allocation4 + $0x1], 0 }
   0xa   :  { %18 = vsyncpa [#allocation9], 0 }
   0xb   :  { %20 = vsyncpa [#allocation9 + $0x1], 0  ;;  %s1003_s12 = smov 0   ;;  %s1005_s13 = smov 0  }
   0xc   :  { %s1007_s14 = smov 0   ;;  %s1009_s15 = smov 0  }
   0xd   :  { %s1011_s16 = smov 0   ;;  %s1013_s17 = smov 0  }
   0xe   :  { %s1015_s18 = smov 0   ;;  %s1017_s19 = smov 0  }
   0xf   :  { %s1019_s20 = smov 0   ;;  %s1021_s21 = smov 0  }
  0x10   :  { %s1023_s22 = smov 0  }
  0x11 LB: > { %1456 = sst [smem:[#allocation14_spill]] %s921_s12  ;;  %s559_s23 = sadd.s32 4294967295, %s961_s22   ;;  %s961_s22 = sphi %s1023_s22, %s26_s22   ;;  %s957_s21 = sphi %s1021_s21, %s1503_s21   ;;  %s953_s20 = sphi %s1019_s20, %s1502_s20   ;;  %s949_s19 = sphi %s1017_s19, %s1501_s19   ;;  %s945_s18 = sphi %s1015_s18, %s1500_s18   ;;  %s941_s17 = sphi %s1013_s17, %s1499_s17   ;;  %s937_s16 = sphi %s1011_s16, %s1498_s16   ;;  %s933_s15 = sphi %s1009_s15, %s1497_s15   ;;  %s929_s14 = sphi %s1007_s14, %s1496_s14   ;;  %s925_s13 = sphi %s1005_s13, %s1495_s13   ;;  %s921_s12 = sphi %s1003_s12, %s1494_s12  }
  0x12   : > { %p52_p0 = scmp.ne.s32.totalorder %s941_s17, %s937_s16  ;;  %p1441_p1 = scmp.eq.s32.totalorder %s961_s22, 0 }
  0x13   : > { %p58_p2 = scmp.ne.s32.totalorder %s937_s16, %s933_s15  ;;  %p1063_p3 = scmp.eq.s32.totalorder %s559_s23, 0 }
  0x14   : > { %p54_p4 = por %p1441_p1, %p52_p0  ;;  %p1440_p6 = scmp.lt.s32.totalorder %s961_s22, 4 }
  0x15   : > { %p1071_p5 = por %p1063_p3, %p58_p2  ;;  %s166_s26 = sand.u32 1, %s941_s17  }
  0x16   : > { %s564_s27 = sshll.u32 %s957_s21, 6  ;;  %s563_s28 = sshll.u32 %s166_s26, 2 }
  0x17   : > { %s1458_s25 = scalar_select %p1071_p5, 1, 0 }
  0x18   : > { %s1459_s0 = sld [smem:[#allocation19_spill]]  ;;  %s170_s5 = scalar_lea.vmem [#allocation2], %s563_s28 }
  0x19   : > { %s177_s6 = sshll.u32 %s170_s5, 4  ;;  %p1085_p7 = pnand %p1440_p6, %p54_p4  ;;  %s1089_s6 = int_to_ptr.vmem [resolvable:$true] %s177_s6 }
  0x1a   : > { %s167_s8 = scalar_lea.sflag [#allocation3], %s166_s26 }
  0x1b   : > { %p729_p11 = pneg %p1085_p7 }
  0x1e   : > { %s1081_s4 = scalar_lea.hbm %s1459_s0, %s564_s27  ;;  %s732_s15 = scalar_lea.hbm %s1459_s0, 128 }
  0x1f   : > { %s727_s9 = scalar_lea.hbm %s1081_s4, 64  ;;  %p733_p0 = scmp.lt.u32.totalorder %s1081_s4, %s1459_s0 }
  0x20   : > { %p728_p10 = scmp.ne.s32.totalorder %s1081_s4, %s727_s9  ;;  %p734_p2 = scmp.lt.u32.totalorder %s732_s15, %s727_s9 }
  0x21   : > { %p736_p6 = scmp.lt.u32.totalorder %s727_s9, %s1081_s4 }
  0x22   : > { %p730_p12 = pnand %p729_p11, %p728_p10  ;;  %p735_p4 = por %p734_p2, %p733_p0 }
  0x24   : > { %p731_p13 = pneg %p730_p12  ;;  %p737_p1 = por %p736_p6, %p735_p4 }
  0x26   : > { %p738_p8 = pnand %p737_p1, %p731_p13 }
  0x28   : > { %741 = shalt.err (!%p738_p8)
}
  0x29   : > { %s742_s26 = scalar_lea.vmem %s1089_s6, 64  ;;  %s979_s29 = smov [#allocation2]  }
  0x2a   : > { %p743_p10 = scmp.ne.s32.totalorder %s1089_s6, %s742_s26  ;;  %s747_s30 = sshll.u32 %s979_s29, 4  ;;  %s748_s30 = int_to_ptr.vmem [resolvable:$false] %s747_s30 }
  0x2b   : > { %s749_s5 = scalar_lea.vmem %s748_s30, 128  ;;  %p750_p5 = scmp.lt.s32.totalorder %s1089_s6, %s748_s30 }
  0x2c   : > { %p745_p12 = pnand %p743_p10, %p729_p11  ;;  %p751_p0 = scmp.lt.s32.totalorder %s749_s5, %s742_s26 }
  0x2e   : > { %p746_p9 = pneg %p745_p12  ;;  %p752_p2 = por %p751_p0, %p750_p5 }
  0x30   : > { %p753_p6 = pnand %p752_p2, %p746_p9 }
  0x32   : > { %756 = shalt.err (!%p753_p6)
}
  0x33   : > { %594 = dma.hbm_to_vmem [thread:$0]  (!%p1085_p7), %s1081_s4, 64, %s1089_s6, %s167_s8  }
  0x34   : > { %p1461_p1 = scmp.lt.s32.totalorder %s961_s22, 5  ;;  %p1462_p5 = scmp.ge.s32.totalorder %s961_s22, 1 }
  0x35   : > { %s45_s9 = sadd.s32 1, %s941_s17  ;;  %s560_s10 = sadd.s32 4294967294, %s961_s22  }
  0x36   : > { %p1122_p8 = pnand %p1462_p5, %p1461_p1  ;;  %s35_s11 = sadd.s32 1, %s953_s20 }
  0x37   : > { %p36_p9 = scmp.ge.s32.totalorder %s35_s11, 2  ;;  %s38_s15 = sadd.s32 1, %s957_s21 }
  0x38   : > { %s73_s27 = sadd.s32 1, %s929_s14  ;;  %p86_p11 = scmp.ne.s32.totalorder %s925_s13, %s921_s12 }
  0x39   : > { %s1505_s11 = smov (%p36_p9, %s35_s11), 0  ;;  %s1507_s15 = smov (!%p36_p9, %s38_s15), %s957_s21 }
  0x3a   : > { %1464 = sst [smem:[#allocation15_spill]] %s1505_s11  ;;  %s69_s4 = ssub.s32 %s953_s20, %s1505_s11 }
  0x3b   : > { %p80_p7 = scmp.ne.s32.totalorder %s929_s14, %s925_s13  ;;  %p40_p13 = scmp.ge.s32.totalorder %s1507_s15, 2 }
  0x3c   : > { %p1142_p4 = por %p86_p11, %p1063_p3  ;;  %p112_p10 = scmp.eq.s32.totalorder %s559_s23, 3 }
  0x3d   : > { %p118_p12 = scmp.eq.s32.totalorder %s560_s10, 3  ;;  %s1509_s15 = smov (%p40_p13, %s1507_s15), 0 }
  0x3e   : > { %s1465_s6 = scalar_select %p1142_p4, 1, 0 }
  0x3f   : > { %1466 = sst [smem:[#allocation16_spill]] %s1509_s15  ;;  %p1150_p0 = por %p112_p10, %p80_p7 }
  0x40   : > { %p1154_p2 = por %p118_p12, %p86_p11  ;;  %s42_s24 = ssub.s32 %s957_s21, %s1509_s15 }
  0x41   : > { %s1467_s8 = scalar_select %p1150_p0, 1, 0 }
  0x42   : > { %s1469_s28 = scalar_select %p1154_p2, 1, 0 }
  0x43   : > { %1468 = sst [smem:[#allocation17_spill]] %s1467_s8  ;;  %p1471_p3 = scmp.eq.s32.totalorder %s961_s22, 0 }
  0x44   : > { %1470 = sst [smem:[#allocation18_spill]] %s1469_s28  ;;  %p43_p1 = scmp.eq.s32.totalorder %s42_s24, 0 }
  0x45   : > { %p1162_p6 = por %p80_p7, %p1471_p3  ;;  %s70_s23 = sor.u32 %s69_s4, %s42_s24 }
  0x46   : > { %p71_p5 = scmp.eq.s32.totalorder %s70_s23, 0  ;;  %s184_s29 = sand.u32 1, %s929_s14  }
  0x47   : > { %s1168_s30 = scalar_select %p43_p1, %s941_s17, %s45_s9  }
  0x48   : > { %s1171_s5 = scalar_select %p71_p5, %s929_s14, %s73_s27  }
  0x49   : > { %s565_s10 = sshll.u32 %s184_s29, 3  ;;  %s566_s0 = sshll.u32 %s957_s21, 1 }
  0x4a   : > { %s193_s11 = sadd.s32 %s953_s20, %s566_s0  ;;  %s188_s15 = scalar_lea.vmem [#allocation5], %s565_s10 }
  0x4b   : > { %s567_s28 = sshll.u32 %s193_s11, 7  ;;  %s197_s12 = sshll.u32 %s188_s15, 4  ;;  %s1180_s12 = int_to_ptr.vmem [resolvable:$true] %s197_s12 }
  0x4c   : > { %s1178_s8 = scalar_lea.hbm %s1437_s1, %s567_s28  ;;  %p1473_p9 = scmp.lt.s32.totalorder %s961_s22, 4 }
  0x4d   : > { %s185_s0 = scalar_lea.sflag [#allocation6], %s184_s29  ;;  %s757_s11 = scalar_lea.hbm %s1178_s8, 128 }
  0x4e   : > { %p1186_p11 = pnand %p1473_p9, %p1162_p6  ;;  %p758_p7 = scmp.ne.s32.totalorder %s1178_s8, %s757_s11 }
  0x4f   : > { %s762_s15 = scalar_lea.hbm %s1437_s1, 512  ;;  %p763_p3 = scmp.lt.u32.totalorder %s1178_s8, %s1437_s1 }
  0x50   : > { %p759_p13 = pneg %p1186_p11  ;;  %p764_p6 = scmp.lt.u32.totalorder %s762_s15, %s757_s11 }
  0x51   : > { %p766_p5 = scmp.lt.u32.totalorder %s757_s11, %s1178_s8 }
  0x52   : > { %p760_p10 = pnand %p759_p13, %p758_p7  ;;  %p765_p1 = por %p764_p6, %p763_p3 }
  0x54   : > { %p761_p12 = pneg %p760_p10  ;;  %p767_p9 = por %p766_p5, %p765_p1 }
  0x56   : > { %p768_p2 = pnand %p767_p9, %p761_p12 }
  0x58   : > { %771 = shalt.err (!%p768_p2)
}
  0x59   : > { %s772_s28 = scalar_lea.vmem %s1180_s12, 128  ;;  %s980_s24 = smov [#allocation5]  }
  0x5a   : > { %p773_p7 = scmp.ne.s32.totalorder %s1180_s12, %s772_s28  ;;  %s777_s26 = sshll.u32 %s980_s24, 4  ;;  %s778_s26 = int_to_ptr.vmem [resolvable:$false] %s777_s26 }
  0x5b   : > { %s779_s23 = scalar_lea.vmem %s778_s26, 256  ;;  %p780_p4 = scmp.lt.s32.totalorder %s1180_s12, %s778_s26 }
  0x5c   : > { %p775_p10 = pnand %p773_p7, %p759_p13  ;;  %p781_p3 = scmp.lt.s32.totalorder %s779_s23, %s772_s28 }
  0x5e   : > { %p776_p0 = pneg %p775_p10  ;;  %p782_p6 = por %p781_p3, %p780_p4 }
  0x60   : > { %p783_p1 = pnand %p782_p6, %p776_p0 }
  0x62   : > { %786 = shalt.err (!%p783_p1)
}
  0x63   : > { %597 = dma.hbm_to_vmem [thread:$0]  (!%p1186_p11), %s1178_s8, 128, %s1180_s12, %s185_s0  }
  0x64   : > { %206 = sbr.rel (%p1122_p8) target bundleno = 762 (0x2fa), region = 28  ;;  %s208_s29 = sand.u32 (!%p1122_p8), 1, %s937_s16  }
  0x65   : > { %s569_s10 = sshll.u32 (!%p1122_p8), %s208_s29, 2  ;;  %s209_s11 = scalar_lea.sflag (!%p1122_p8), [#allocation3], %s208_s29 }
  0x66   : > { %s212_s2 = scalar_lea.vmem (!%p1122_p8), [#allocation2], %s569_s10  ;;  %p1475_p2 = scmp.ne.s32.totalorder (!%p1122_p8), %s1458_s25, 0 }
  0x6b   : > { %904 = dma.done.wait (%p1475_p2), %s209_s11, 64  }
  0x6c   : > { %906 = vsyncadd (%p1475_p2), %s209_s11, 4294967232  ;;  %s1223_s9 = sand.u32 1, %s925_s13   ;;  %p1476_p8 = scmp.ne.s32.totalorder %s1465_s6, 0 }
  0x6d   : > { %s1226_s12 = sshll.u32 %s1223_s9, 3  ;;  %s218_s7 = scalar_lea.sflag [#allocation6], %s1223_s9 }
  0x6e   : > { %s221_s8 = scalar_lea.vmem [#allocation5], %s1226_s12 }
  0x6f   : > { %908 = dma.done.wait (%p1476_p8), %s218_s7, 128  }
  0x70   : > { %910 = vsyncadd (%p1476_p8), %s218_s7, 4294967168  ;;  %v255_v0 = vlaneseq  ;;  %v254_v7 = vld [vmem:[%s212_s2] sm:$0xf]  ;;  %v276_v8 = vld [vmem:[%s221_s8] sm:$0xff]  ;;  %s246_s25 = scalar_lea.vmem [#allocation7], %s1226_s12  ;;  %s253_s6 = scalar_lea.vmem [#allocation8], %s1226_s12 }
  0x71   : > { %vm277_vm0 = vcmp.gt.f32.partialorder %v276_v8, 0.01  ;;  %v1252_v17 = vmov 0   ;;  %v1254_v18 = vmov -1e+30   ;;  %s1258_s0 = smov 0  }
  0x72   : > { %v256_v1 = vshrl.u32 %v255_v0, 7  ;;  %v1234_v2 = vand.u32 127, %v255_v0  ;;  %v278_v15 = vsel %vm277_vm0, %v276_v8, -1e+30  }
  0x74   : > { %v257_v3 = vsub.s32 0, %v256_v1  ;;  %v261_v4 = vsub.s32 1, %v256_v1  ;;  %v265_v5 = vsub.s32 2, %v256_v1  ;;  %v269_v6 = vsub.s32 3, %v256_v1 }
  0x76   : > { %v1236_v9 = vrot.slane %v254_v7, %v257_v3  ;;  %v1238_v10 = vrot.slane %v254_v7, %v261_v4  ;;  %v1240_v11 = vrot.slane %v254_v7, %v265_v5  ;;  %v1242_v12 = vrot.slane %v254_v7, %v269_v6 }
  0x78   : > { %v271_v13 = vsub.f32 %v1240_v11, %v1236_v9  ;;  %v272_v14 = vsub.f32 %v1242_v12, %v1238_v10 }
  0x7a   : > { %v1248_v16 = vmul.f32 %v272_v14, %v271_v13 }
  0x7b LB: >> { %291 = vmax.xlane.f32.xlu0 %v973_v15  ;;  %v311_v19 = vstv %s977_s0  ;;  %s361_s3 = sadd.s32 1, %s977_s0   ;;  %s977_s0 = sphi %s1258_s0, %s1483_s0   ;;  %v973_v15 = vphi %v278_v15, %v351_v15   ;;  %v969_v18 = vphi %v1254_v18, %v1482_v18   ;;  %v965_v17 = vphi %v1252_v17, %v1481_v17  }
  0x7c   : >> { %vm1273_vm1 = vcmp.eq.s32.totalorder %v1234_v2, %v311_v19  ;;  %p285_p0 = scmp.lt.s32.totalorder %s361_s3, 100  ;;  %s1483_s0 = smov %s361_s3 }
 0x108   : >> { %v1270_v20 = vpop.xlane.xlu0 %291 }
 0x109   : >> { %vm294_vm2 = vcmp.ge.f32.partialorder %v973_v15, %v1270_v20  ;;  %v352_v22 = vrot.slane %v1270_v20, 4  ;;  %vm293_vm3 = vcmp.gt.f32.partialorder %v1270_v20, -5e+29 }
 0x10a   : >> { %v295_v23 = vsel %vm294_vm2, %v1234_v2, 128  ;;  %v313_v24 = vsel %vm293_vm3, %v1270_v20, -1e+30 }
 0x10b   : >> { %v297_v25 = vshra.s32 %v295_v23, 16  ;;  %v353_v26 = vmax.f32 %v1270_v20, %v352_v22  ;;  %v316_v27 = vsel %vm1273_vm1, %v313_v24, %v969_v18   ;;  %v296_v33 = vand.u32 65535, %v295_v23 }
 0x10c   : >> { %v1482_v18 = vmov %v316_v27 }
 0x10d   : >> { %v299_v28 = vcvt.s32.f32 %v297_v25  ;;  %v354_v29 = vrot.slane %v353_v26, 2  ;;  %v298_v35 = vcvt.s32.f32 %v296_v33 }
 0x10f   : >> { %300 = vmin.xlane.f32.xlu0 %v299_v28  ;;  %v355_v30 = vmax.f32 %v353_v26, %v354_v29 }
 0x111   : >> { %v356_v31 = vrot.slane %v355_v30, 1 }
 0x113   : >> { %v357_v32 = vmax.f32 %v355_v30, %v356_v31 }
 0x115   : >> { %581 = vpush %v357_v32 }
 0x146   : >> { %s1289_s15 = spop %581 }
 0x147   : >> { %p359_p4 = scmp.gt.f32.partialorder %s1289_s15, -5e+29 }
 0x149   : >> { %p287_p11 = pnand %p359_p4, %p285_p0 }
 0x14a   : > { %s1484_s27 = sld [smem:[#allocation17_spill]] (%p287_p11)  ;;  %362 = vst [vmem:[%s246_s25] sm:$0xff] (%p287_p11), %v316_v27  ;;  %s575_s4 = sshll.u32 (%p287_p11), %s949_s19, 1 }
 0x14b   : > { %s1343_s28 = sadd.s32 (%p287_p11), %s945_s18, %s575_s4  ;;  %s385_s24 = sshll.u32 (%p287_p11), %s246_s25, 4  ;;  %s1348_s24 = int_to_ptr.vmem [resolvable:$true] %s385_s24 }
 0x14c   : > { %s576_s26 = sshll.u32 (%p287_p11), %s1343_s28, 7  ;;  %s1485_s10 = sld [smem:[#allocation20_spill]] (%p287_p11) }
 0x14d   : > { %s365_s2 = scalar_lea.sflag (%p287_p11), [#allocation4], %s1223_s9  ;;  %s787_s7 = scalar_lea.vmem (%p287_p11), %s1348_s24, 128 }
 0x14e   : > { %p788_p13 = scmp.ne.s32.totalorder (%p287_p11), %s1348_s24, %s787_s7  ;;  %s981_s18 = smov (%p287_p11), [#allocation7]  }
 0x14f   : > { %s791_s19 = sshll.u32 (%p287_p11), %s981_s18, 4  ;;  %s792_s19 = int_to_ptr.vmem [resolvable:$false] %s791_s19 }
 0x150   : > { %p1486_p12 = scmp.ne.s32.totalorder (%p287_p11), %s1484_s27, 0  ;;  %s793_s8 = scalar_lea.vmem (%p287_p11), %s792_s19, 256 }
 0x151   : > { %p794_p7 = scmp.lt.s32.totalorder (%p287_p11), %s1348_s24, %s792_s19  ;;  %p795_p10 = scmp.lt.s32.totalorder (%p287_p11), %s793_s8, %s787_s7 }
 0x152   : > { %s383_s11 = scalar_lea.hbm (%p287_p11), %s1485_s10, %s576_s26  ;;  %p789_p5 = pnand (%p287_p11), %p788_p13, %p1486_p12 }
 0x153   : > { %p796_p3 = por (%p287_p11), %p795_p10, %p794_p7 }
 0x154   : > { %p790_p9 = pneg (%p287_p11), %p789_p5 }
 0x156   : > { %p797_p6 = pnand (%p287_p11), %p796_p3, %p790_p9 }
 0x19c   : >> { %v301_v34 = vpop.xlane.xlu0 %300 }
 0x19d   : >> { %vm302_vm4 = vcmp.eq.f32.partialorder %v299_v28, %v301_v34  ;;  %v307_v37 = vcvt.f32.s32 %v301_v34 }
 0x19e   : >> { %v303_v36 = vsel %vm302_vm4, %v298_v35, inf }
 0x19f   : >> { %304 = vmin.xlane.f32.xlu1 %v303_v36  ;;  %v308_v39 = vshll.u32 %v307_v37, 16 }
 0x22c   : >> { %v305_v38 = vpop.xlane.xlu1 %304 }
 0x22d   : >> { %v306_v40 = vcvt.f32.s32 %v305_v38 }
 0x22f   : >> { %v309_v41 = vadd.s32 %v308_v39, %v306_v40 }
 0x231   : >> { %vm1293_vm5 = vcmp.eq.s32.totalorder %v1234_v2, %v309_v41  ;;  %v317_v43 = vsel %vm293_vm3, %v309_v41, 0 }
 0x232   : >> { %v318_v44 = vsel %vm1273_vm1, %v317_v43, %v965_v17   ;;  %v322_v45 = vsel %vm1293_vm5, %v1238_v10, 0.0  ;;  %v319_v46 = vsel %vm1293_vm5, %v1236_v9, 0.0  ;;  %v328_v47 = vsel %vm1293_vm5, %v1242_v12, 0.0 }
 0x233   : >> { %323 = vadd.xlane.f32.xlu0 %v322_v45  ;;  %320 = vadd.xlane.f32.xlu1 %v319_v46  ;;  %v325_v48 = vsel %vm1293_vm5, %v1240_v11, 0.0  ;;  %v1481_v17 = vmov %v318_v44  ;;  %363 = vst [vmem:[%s253_s6] sm:$0xff] (%p287_p11), %v318_v44 }
 0x237   : >> { %329 = vadd.xlane.f32.xlu0 %v328_v47  ;;  %326 = vadd.xlane.f32.xlu1 %v325_v48 }
 0x2c0   : >> { %v324_v49 = vpop.xlane.xlu0 %323  ;;  %v321_v50 = vpop.xlane.xlu1 %320 }
 0x2c1   : >> { %v336_v51 = vmax.f32 %v324_v49, %v1238_v10  ;;  %v332_v52 = vmax.f32 %v321_v50, %v1236_v9 }
 0x2c4   : >> { %v330_v53 = vpop.xlane.xlu0 %329  ;;  %v327_v54 = vpop.xlane.xlu1 %326 }
 0x2c5   : >> { %v335_v55 = vmin.f32 %v330_v53, %v1242_v12  ;;  %v341_v56 = vsub.f32 %v330_v53, %v324_v49  ;;  %v331_v57 = vmin.f32 %v327_v54, %v1240_v11  ;;  %v340_v58 = vsub.f32 %v327_v54, %v321_v50 }
 0x2c7   : >> { %v337_v59 = vsub.f32 %v335_v55, %v336_v51  ;;  %v333_v60 = vsub.f32 %v331_v57, %v332_v52  ;;  %v342_v61 = vmul.f32 %v341_v56, %v340_v58 }
 0x2c9   : >> { %v338_v62 = vmax.f32 %v337_v59, 0.0  ;;  %v334_v63 = vmax.f32 %v333_v60, 0.0  ;;  %v343_v1 = vadd.f32 %v342_v61, %v1248_v16 }
 0x2cb   : >> { %v339_v0 = vmul.f32 %v338_v62, %v334_v63 }
 0x2cd   : >> { %v344_v3 = vsub.f32 %v343_v1, %v339_v0 }
 0x2ce   : > { %290 = sbr.rel (!%p287_p11) target bundleno = 123 (0x7b), region = 110 }
 0x2cf   : >> { %v345_v4 = vmul.f32 0.5, %v344_v3 }
 0x2d1   : >> { %vm346_vm6 = vcmp.gt.f32.partialorder %v339_v0, %v345_v4 }
 0x2d2   : >> { %vm347_vm7 = vmor %vm346_vm6, %vm1293_vm5 }
 0x2d3   : >> { %vm350_vm8 = vmand %vm347_vm7, %vm293_vm3 }
 0x2d4   : >> { %v351_v15 = vsel %vm350_vm8, -1e+30, %v973_v15  }
 0x2d5   : > { %800 = shalt.err (!%p797_p6)
}
 0x2d6   : > { %s801_s25 = scalar_lea.hbm %s383_s11, 128  ;;  %s805_s15 = scalar_lea.hbm %s1485_s10, 512 }
 0x2d7   : > { %p802_p1 = scmp.ne.s32.totalorder %s383_s11, %s801_s25  ;;  %p806_p4 = scmp.lt.u32.totalorder %s383_s11, %s1485_s10 }
 0x2d8   : > { %p807_p0 = scmp.lt.u32.totalorder %s805_s15, %s801_s25  ;;  %p809_p13 = scmp.lt.u32.totalorder %s801_s25, %s383_s11 }
 0x2d9   : > { %p803_p2 = pnand %p802_p1, %p1486_p12 }
 0x2da   : > { %p808_p11 = por %p807_p0, %p806_p4 }
 0x2db   : > { %p804_p8 = pneg %p803_p2 }
 0x2dc   : > { %p810_p5 = por %p809_p13, %p808_p11 }
 0x2de   : > { %p811_p9 = pnand %p810_p5, %p804_p8 }
 0x2e0   : > { %814 = shalt.err (!%p811_p9)
}
 0x2e1   : > { %587 = dma.vmem_to_hbm [thread:$0]  (%p1486_p12), %s1348_s24, 128, %s383_s11, %s365_s2  }
 0x2e2   : > { %s1487_s18 = sld [smem:[#allocation21_spill]]  ;;  %s400_s0 = sshll.u32 %s253_s6, 4  ;;  %s401_s0 = int_to_ptr.vmem [resolvable:$true] %s400_s0 }
 0x2e3   : > { %s370_s25 = scalar_lea.sflag [#allocation9], %s1223_s9  ;;  %s815_s3 = scalar_lea.vmem %s401_s0, 128 }
 0x2e4   : > { %p816_p7 = scmp.ne.s32.totalorder %s401_s0, %s815_s3  ;;  %s982_s15 = smov [#allocation8]  }
 0x2e5   : > { %s819_s4 = sshll.u32 %s982_s15, 4  ;;  %s820_s4 = int_to_ptr.vmem [resolvable:$false] %s819_s4 }
 0x2e6   : > { %p817_p10 = pnand %p816_p7, %p1486_p12  ;;  %s821_s23 = scalar_lea.vmem %s820_s4, 256 }
 0x2e7   : > { %p822_p6 = scmp.lt.s32.totalorder %s401_s0, %s820_s4  ;;  %p823_p1 = scmp.lt.s32.totalorder %s821_s23, %s815_s3 }
 0x2e8   : > { %s1488_s8 = smov %s1487_s18  ;;  %s1377_s19 = scalar_lea.hbm %s1487_s18, %s576_s26 }
 0x2e9   : > { %p818_p3 = pneg %p817_p10  ;;  %p824_p2 = por %p823_p1, %p822_p6 }
 0x2eb   : > { %p825_p8 = pnand %p824_p2, %p818_p3 }
 0x2ed   : > { %828 = shalt.err (!%p825_p8)
}
 0x2ee   : > { %s829_s9 = scalar_lea.hbm %s1377_s19, 128  ;;  %s833_s28 = scalar_lea.hbm %s1488_s8, 512 }
 0x2ef   : > { %p830_p4 = scmp.ne.s32.totalorder %s1377_s19, %s829_s9  ;;  %p834_p13 = scmp.lt.u32.totalorder %s1377_s19, %s1488_s8 }
 0x2f0   : > { %p835_p5 = scmp.lt.u32.totalorder %s833_s28, %s829_s9  ;;  %p837_p7 = scmp.lt.u32.totalorder %s829_s9, %s1377_s19 }
 0x2f1   : > { %p831_p0 = pnand %p830_p4, %p1486_p12 }
 0x2f2   : > { %p836_p9 = por %p835_p5, %p834_p13 }
 0x2f3   : > { %p832_p11 = pneg %p831_p0 }
 0x2f4   : > { %p838_p10 = por %p837_p7, %p836_p9 }
 0x2f6   : > { %p839_p3 = pnand %p838_p10, %p832_p11 }
 0x2f8   : > { %842 = shalt.err (!%p839_p3)
}
 0x2f9   : > { %588 = dma.vmem_to_hbm [thread:$0]  (%p1486_p12), %s401_s0, 128, %s1377_s19, %s370_s25  }
 0x2fa PF: > { %s1489_s11 = sld [smem:[#allocation14_spill]]  ;;  %s1490_s2 = sld [smem:[#allocation18_spill]] }
 0x2fb   : > { %p606_p6 = scmp.ge.s32.totalorder %s961_s22, 2 }
 0x300   : > { %s412_s29 = sand.u32 1, %s1489_s11   ;;  %p1491_p1 = scmp.ne.s32.totalorder %s1490_s2, 0 }
 0x301   : > { %s413_s7 = scalar_lea.sflag [#allocation4], %s412_s29 }
 0x302   : > { %p599_p2 = pnand %p606_p6, %p1491_p1 }
 0x304   : > { %912 = dma.done.wait (!%p599_p2), %s413_s7, 128  }
 0x305   : > { %914 = vsyncadd (!%p599_p2), %s413_s7, 4294967168  ;;  %s422_s18 = scalar_lea.sflag [#allocation9], %s412_s29 }
 0x306   : > { %916 = dma.done.wait (!%p599_p2), %s422_s18, 128  }
 0x307   : > { %918 = vsyncadd (!%p599_p2), %s422_s18, 4294967168  ;;  %s26_s22 = sadd.s32 1, %s961_s22   ;;  %s1492_s27 = sld [smem:[#allocation15_spill]] }
 0x308   : > { %p23_p8 = scmp.ge.s32.totalorder %s26_s22, 6   ;;  %s1493_s0 = sld [smem:[#allocation16_spill]] }
 0x309   : > { %s1494_s12 = smov %s925_s13  ;;  %s1495_s13 = smov %s929_s14 }
 0x30a   : > { %s1496_s14 = smov %s1171_s5  ;;  %s1497_s15 = smov %s937_s16 }
 0x30b   : > { %s1498_s16 = smov %s941_s17  ;;  %s1499_s17 = smov %s1168_s30 }
 0x30c   : > { %s1500_s18 = smov %s953_s20  ;;  %s1501_s19 = smov %s957_s21 }
 0x30d   : > { %s1502_s20 = smov %s1492_s27  ;;  %25 = sbr.rel (!%p23_p8) target bundleno = 17 (0x11), region = 121 }
 0x30e   : > { %s1503_s21 = smov %s1493_s0 }
 0x314   :  { %427 = vsyncpa [#allocation3], 1 }
 0x315   :  { %429 = vsyncpa [#allocation3 + $0x1], 1 }
 0x316   :  { %430 = vsyncpa [#allocation6], 1 }
 0x317   :  { %432 = vsyncpa [#allocation6 + $0x1], 1 }
 0x318   :  { %433 = vsyncpa [#allocation4], 1 }
 0x319   :  { %435 = vsyncpa [#allocation4 + $0x1], 1 }
 0x31a   :  { %436 = vsyncpa [#allocation9], 1 }
 0x31b   :  { %438 = vsyncpa [#allocation9 + $0x1], 1 }

</bundles_post_ra>
